<compile_context>
chip_gen: v7x
topology: tpu7x:2x2x1
jax: 0.10.0
libtpu: 0.0.40
codegen_flags: <defaults>
</compile_context>

<pallas_src>
import functools

import jax
import jax.numpy as jnp
from jax.experimental import pallas as pl
from jax.experimental.pallas import tpu as pltpu


def cross_attn_kernel(q_ref, k_ref, v_ref, wq_ref, wkv_ref, wo_ref, b_ref,
                      out_ref, *, num_heads, scale):
    f32 = jnp.float32
    bf16 = jnp.bfloat16
    H = num_heads

    B, N1, q_dim = q_ref.shape
    _, N2, kv_dim = k_ref.shape
    E = wo_ref.shape[0]
    hd = E // H

    # Batch folded into the row (sublane) axis -> one lane-dense, full-width
    # projection per activation.  bf16 MXU operands, f32 accumulation, f32
    # bias adds and all further elementwise math in f32.
    q2 = q_ref[...].reshape(B * N1, q_dim)
    k2 = k_ref[...].reshape(B * N2, kv_dim)
    v2 = v_ref[...].reshape(B * N2, kv_dim)

    Q = jnp.dot(q2, wq_ref[...], preferred_element_type=f32) + b_ref[0]
    K = jnp.dot(k2, wkv_ref[0], preferred_element_type=f32) + b_ref[1]
    V = jnp.dot(v2, wkv_ref[1], preferred_element_type=f32) + b_ref[2]

    # Fold the softmax scale into Q once (O(rows*E) instead of O(H*N1*N2)).
    Qs = (Q * scale).astype(bf16).reshape(B, N1, E)
    Ks = K.astype(bf16).reshape(B, N2, E)
    Vs = V.astype(bf16).reshape(B, N2, E)

    # Per-head attention core.  H is tiny and static, so a fully-unrolled
    # Python loop of single-batch-dim einsums (batch = B, exactly the pattern
    # Mosaic lowers well) with static lane slices per head keeps every op in
    # well-supported territory; compute here is nanoseconds either way.
    ctx = []
    for h in range(H):
        sl = slice(h * hd, (h + 1) * hd)
        qh = Qs[:, :, sl]                          # (B, N1, hd) bf16
        kh = Ks[:, :, sl]                          # (B, N2, hd) bf16
        vh = Vs[:, :, sl]                          # (B, N2, hd) bf16
        s = jnp.einsum('bqd,bkd->bqk', qh, kh, preferred_element_type=f32)
        # Numerically stable softmax in f32; reciprocal on the idle EUP slot.
        s = s - jnp.max(s, axis=-1, keepdims=True)
        p = jnp.exp(s)
        p = p * pl.reciprocal(jnp.sum(p, axis=-1, keepdims=True), approx=True)
        ctx.append(jnp.einsum('bqk,bkd->bqd', p.astype(bf16), vh,
                              preferred_element_type=f32).astype(bf16))

    # concat_heads(o) @ Wo + bo: one lane-dense (rows, E) x (E, E) matmul; the
    # head reduction rides inside the MXU contraction instead of a VALU sum.
    o_cat = jnp.concatenate(ctx, axis=-1).reshape(B * N1, E)       # bf16
    out = jnp.dot(o_cat, wo_ref[...], preferred_element_type=f32) + b_ref[3]

    out_ref[...] = out.reshape(B, N1, E).astype(out_ref.dtype)


def cross_attention(query, key, value, params, num_heads, mask=None):
    # `mask` is accepted for API parity with the PyTorch module but -- exactly
    # like the reference forward -- it is never used.
    del mask
    B, N1, q_dim = query.shape
    _, N2, kv_dim = key.shape
    E = params["wq"].shape[1]
    assert E % num_heads == 0
    scale = float(num_heads) ** (-0.5)        # matches the PyTorch module

    bf16 = jnp.bfloat16
    f32 = jnp.float32

    # Parameter packing (one-time, wrapper side): Wk/Wv share a slab, all four
    # biases share a slab -> fewer DMA descriptor chains per invocation.
    wq = params["wq"].astype(bf16)                                        # (q_dim, E)
    wkv = jnp.stack([params["wk"], params["wv"]], axis=0).astype(bf16)    # (2, kv_dim, E)
    wo = params["wo"].astype(bf16)                                        # (E, E)
    biases = jnp.stack([params["bq"].reshape(1, E), params["bk"].reshape(1, E),
                        params["bv"].reshape(1, E), params["bo"].reshape(1, E)],
                       axis=0).astype(f32)                                # (4, 1, E)

    qb, kb, vb = query.astype(bf16), key.astype(bf16), value.astype(bf16)

    kernel = functools.partial(cross_attn_kernel, num_heads=num_heads, scale=scale)

    # Single grid step; every block equals the full array (satisfies the
    # (8,128) rule trivially) and the batch is processed inside the kernel.
    in_specs = [
        pl.BlockSpec((B, N1, q_dim), lambda i: (0, 0, 0)),     # query
        pl.BlockSpec((B, N2, kv_dim), lambda i: (0, 0, 0)),    # key
        pl.BlockSpec((B, N2, kv_dim), lambda i: (0, 0, 0)),    # value
        pl.BlockSpec((q_dim, E), lambda i: (0, 0)),            # Wq
        pl.BlockSpec((2, kv_dim, E), lambda i: (0, 0, 0)),     # packed Wk/Wv
        pl.BlockSpec((E, E), lambda i: (0, 0)),                # Wo
        pl.BlockSpec((4, 1, E), lambda i: (0, 0, 0)),          # packed bq/bk/bv/bo
    ]
    out_specs = pl.BlockSpec((B, N1, E), lambda i: (0, 0, 0))

    return pl.pallas_call(
        kernel,
        out_shape=jax.ShapeDtypeStruct((B, N1, E), jnp.float32),
        grid_spec=pltpu.PrefetchScalarGridSpec(
            num_scalar_prefetch=0,
            grid=(1,),
            in_specs=in_specs,
            out_specs=out_specs,
        ),
        compiler_params=pltpu.CompilerParams(
            dimension_semantics=("arbitrary",)),
    )(qb, kb, vb, wq, wkv, wo, biases)


def reference_cross_attention(query, key, value, params, num_heads):
    """Pure-JAX f32 reference mirroring the PyTorch forward (verification)."""
    B, N1, _ = query.shape
    _, N2, _ = key.shape
    E = params["wq"].shape[1]
    hd = E // num_heads
    scale = float(num_heads) ** (-0.5)
    Q = query @ params["wq"] + params["bq"]
    K = key @ params["wk"] + params["bk"]
    V = value @ params["wv"] + params["bv"]
    Q = Q.reshape(B, N1, num_heads, hd).transpose(0, 2, 1, 3)
    K = K.reshape(B, N2, num_heads, hd).transpose(0, 2, 1, 3)
    V = V.reshape(B, N2, num_heads, hd).transpose(0, 2, 1, 3)
    att = (Q @ jnp.swapaxes(K, -2, -1)) * scale
    att = jax.nn.softmax(att, axis=-1)
    out = (att @ V).transpose(0, 2, 1, 3).reshape(B, N1, E)
    return out @ params["wo"] + params["bo"]


def init_params(key, q_dim, kv_dim, embed_dim):
    """Deterministic synthetic init (PyTorch Linear shapes, stored transposed)."""
    ks = jax.random.split(key, 8)
    def lin(kw, kb, fan_in, fan_out):
        bound = 1.0 / (fan_in ** 0.5)
        w = jax.random.uniform(kw, (fan_in, fan_out), jnp.float32, -bound, bound)
        b = jax.random.uniform(kb, (1, fan_out), jnp.float32, -bound, bound)
        return w, b
    wq, bq = lin(ks[0], ks[1], q_dim, embed_dim)
    wk, bk = lin(ks[2], ks[3], kv_dim, embed_dim)
    wv, bv = lin(ks[4], ks[5], kv_dim, embed_dim)
    wo, bo = lin(ks[6], ks[7], embed_dim, embed_dim)
    return dict(wq=wq, bq=bq, wk=wk, bk=bk, wv=wv, bv=bv, wo=wo, bo=bo)


if __name__ == "__main__":
    # Small shapes consistent with the module's forward.
    B, N1, N2 = 2, 8, 8
    q_dim, kv_dim, embed_dim, num_heads = 32, 32, 32, 4

    root = jax.random.PRNGKey(0)
    kq, kk, kv_, kp = jax.random.split(root, 4)
    query = jax.random.normal(kq, (B, N1, q_dim), jnp.float32)
    key = jax.random.normal(kk, (B, N2, kv_dim), jnp.float32)
    value = jax.random.normal(kv_, (B, N2, kv_dim), jnp.float32)
    params = init_params(kp, q_dim, kv_dim, embed_dim)

    out = cross_attention(query, key, value, params, num_heads)
    out = jax.block_until_ready(out)

    ref = reference_cross_attention(query, key, value, params, num_heads)
    assert out.shape == (B, N1, embed_dim)
    # bf16 MXU operands + approx reciprocal -> compare against the f32
    # reference with a correspondingly loose tolerance.
    max_err = float(jnp.max(jnp.abs(out - ref)))
    assert jnp.allclose(out, ref, atol=5e-2, rtol=5e-2), \
        f"mismatch vs reference, max|err|={max_err}"

    print("KERNEL_OK")
</pallas_src>

<mosaic_0001>
module attributes {stable_mosaic.version = 11 : i64} {
  func.func @cross_attn_kernel(%arg0: i32, %arg1: memref<2x8x32xbf16, #tpu.memory_space<vmem>>, %arg2: memref<2x8x32xbf16, #tpu.memory_space<vmem>>, %arg3: memref<2x8x32xbf16, #tpu.memory_space<vmem>>, %arg4: memref<32x32xbf16, #tpu.memory_space<vmem>>, %arg5: memref<2x32x32xbf16, #tpu.memory_space<vmem>>, %arg6: memref<32x32xbf16, #tpu.memory_space<vmem>>, %arg7: memref<4x1x32xf32, #tpu.memory_space<vmem>>, %arg8: memref<2x8x32xf32, #tpu.memory_space<vmem>>) attributes {dimension_semantics = [#tpu.dimension_semantics<arbitrary>], iteration_bounds = array<i64: 1>, scalar_prefetch = 0 : i64, scratch_operands = 0 : i64, tpu.core_type = #tpu.core_type<tc>, window_params = [{pipeline_mode = #tpu.pipeline_mode<synchronous>, transform_indices = @transform_0, window_bounds = array<i64: 2, 8, 32>}, {pipeline_mode = #tpu.pipeline_mode<synchronous>, transform_indices = @transform_1, window_bounds = array<i64: 2, 8, 32>}, {pipeline_mode = #tpu.pipeline_mode<synchronous>, transform_indices = @transform_2, window_bounds = array<i64: 2, 8, 32>}, {pipeline_mode = #tpu.pipeline_mode<synchronous>, transform_indices = @transform_3, window_bounds = array<i64: 32, 32>}, {pipeline_mode = #tpu.pipeline_mode<synchronous>, transform_indices = @transform_4, window_bounds = array<i64: 2, 32, 32>}, {pipeline_mode = #tpu.pipeline_mode<synchronous>, transform_indices = @transform_5, window_bounds = array<i64: 32, 32>}, {pipeline_mode = #tpu.pipeline_mode<synchronous>, transform_indices = @transform_6, window_bounds = array<i64: 4, 1, 32>}, {pipeline_mode = #tpu.pipeline_mode<synchronous>, transform_indices = @transform_7, window_bounds = array<i64: 2, 8, 32>}]} {
    %c0 = arith.constant 0 : index
    %c0_0 = arith.constant 0 : index
    %c0_1 = arith.constant 0 : index
    %0 = vector.load %arg1[%c0, %c0_0, %c0_1] : memref<2x8x32xbf16, #tpu.memory_space<vmem>>, vector<2x8x32xbf16>
    %1 = vector.shape_cast %0 : vector<2x8x32xbf16> to vector<16x32xbf16>
    %c0_2 = arith.constant 0 : index
    %c0_3 = arith.constant 0 : index
    %c0_4 = arith.constant 0 : index
    %2 = vector.load %arg2[%c0_2, %c0_3, %c0_4] : memref<2x8x32xbf16, #tpu.memory_space<vmem>>, vector<2x8x32xbf16>
    %3 = vector.shape_cast %2 : vector<2x8x32xbf16> to vector<16x32xbf16>
    %c0_5 = arith.constant 0 : index
    %c0_6 = arith.constant 0 : index
    %c0_7 = arith.constant 0 : index
    %4 = vector.load %arg3[%c0_5, %c0_6, %c0_7] : memref<2x8x32xbf16, #tpu.memory_space<vmem>>, vector<2x8x32xbf16>
    %5 = vector.shape_cast %4 : vector<2x8x32xbf16> to vector<16x32xbf16>
    %c0_8 = arith.constant 0 : index
    %c0_9 = arith.constant 0 : index
    %6 = vector.load %arg4[%c0_8, %c0_9] : memref<32x32xbf16, #tpu.memory_space<vmem>>, vector<32x32xbf16>
    %cst = arith.constant dense<0.000000e+00> : vector<16x32xf32>
    %7 = tpu.matmul %1, %6, %cst {dimension_numbers = #tpu.dot_dimension_numbers<[1], [0], [0], [1], [0, 0, 1, 1], [], []>} : vector<16x32xbf16>, vector<32x32xbf16>, vector<16x32xf32> -> vector<16x32xf32>
    %c0_10 = arith.constant 0 : index
    %c0_11 = arith.constant 0 : index
    %c0_12 = arith.constant 0 : index
    %8 = vector.load %arg7[%c0_10, %c0_11, %c0_12] : memref<4x1x32xf32, #tpu.memory_space<vmem>>, vector<1x1x32xf32>
    %9 = vector.shape_cast %8 : vector<1x1x32xf32> to vector<1x32xf32>
    %10 = vector.broadcast %9 : vector<1x32xf32> to vector<16x32xf32>
    %11 = arith.addf %7, %10 : vector<16x32xf32>
    %c0_13 = arith.constant 0 : index
    %c0_14 = arith.constant 0 : index
    %c0_15 = arith.constant 0 : index
    %12 = vector.load %arg5[%c0_13, %c0_14, %c0_15] : memref<2x32x32xbf16, #tpu.memory_space<vmem>>, vector<1x32x32xbf16>
    %13 = vector.shape_cast %12 : vector<1x32x32xbf16> to vector<32x32xbf16>
    %cst_16 = arith.constant dense<0.000000e+00> : vector<16x32xf32>
    %14 = tpu.matmul %3, %13, %cst_16 {dimension_numbers = #tpu.dot_dimension_numbers<[1], [0], [0], [1], [0, 0, 1, 1], [], []>} : vector<16x32xbf16>, vector<32x32xbf16>, vector<16x32xf32> -> vector<16x32xf32>
    %c1 = arith.constant 1 : index
    %c0_17 = arith.constant 0 : index
    %c0_18 = arith.constant 0 : index
    %15 = vector.load %arg7[%c1, %c0_17, %c0_18] : memref<4x1x32xf32, #tpu.memory_space<vmem>>, vector<1x1x32xf32>
    %16 = vector.shape_cast %15 : vector<1x1x32xf32> to vector<1x32xf32>
    %17 = vector.broadcast %16 : vector<1x32xf32> to vector<16x32xf32>
    %18 = arith.addf %14, %17 : vector<16x32xf32>
    %c1_19 = arith.constant 1 : index
    %c0_20 = arith.constant 0 : index
    %c0_21 = arith.constant 0 : index
    %19 = vector.load %arg5[%c1_19, %c0_20, %c0_21] : memref<2x32x32xbf16, #tpu.memory_space<vmem>>, vector<1x32x32xbf16>
    %20 = vector.shape_cast %19 : vector<1x32x32xbf16> to vector<32x32xbf16>
    %cst_22 = arith.constant dense<0.000000e+00> : vector<16x32xf32>
    %21 = tpu.matmul %5, %20, %cst_22 {dimension_numbers = #tpu.dot_dimension_numbers<[1], [0], [0], [1], [0, 0, 1, 1], [], []>} : vector<16x32xbf16>, vector<32x32xbf16>, vector<16x32xf32> -> vector<16x32xf32>
    %c2 = arith.constant 2 : index
    %c0_23 = arith.constant 0 : index
    %c0_24 = arith.constant 0 : index
    %22 = vector.load %arg7[%c2, %c0_23, %c0_24] : memref<4x1x32xf32, #tpu.memory_space<vmem>>, vector<1x1x32xf32>
    %23 = vector.shape_cast %22 : vector<1x1x32xf32> to vector<1x32xf32>
    %24 = vector.broadcast %23 : vector<1x32xf32> to vector<16x32xf32>
    %25 = arith.addf %21, %24 : vector<16x32xf32>
    %cst_25 = arith.constant 5.000000e-01 : f32
    %26 = vector.broadcast %cst_25 : f32 to vector<16x32xf32>
    %27 = arith.mulf %11, %26 : vector<16x32xf32>
    %28 = arith.truncf %27 : vector<16x32xf32> to vector<16x32xbf16>
    %29 = vector.shape_cast %28 : vector<16x32xbf16> to vector<2x8x32xbf16>
    %30 = arith.truncf %18 : vector<16x32xf32> to vector<16x32xbf16>
    %31 = vector.shape_cast %30 : vector<16x32xbf16> to vector<2x8x32xbf16>
    %32 = arith.truncf %25 : vector<16x32xf32> to vector<16x32xbf16>
    %33 = vector.shape_cast %32 : vector<16x32xbf16> to vector<2x8x32xbf16>
    %34 = vector.extract_strided_slice %29 {offsets = [0, 0, 0], sizes = [2, 8, 8], strides = [1, 1, 1]} : vector<2x8x32xbf16> to vector<2x8x8xbf16>
    %35 = vector.extract_strided_slice %31 {offsets = [0, 0, 0], sizes = [2, 8, 8], strides = [1, 1, 1]} : vector<2x8x32xbf16> to vector<2x8x8xbf16>
    %36 = vector.extract_strided_slice %33 {offsets = [0, 0, 0], sizes = [2, 8, 8], strides = [1, 1, 1]} : vector<2x8x32xbf16> to vector<2x8x8xbf16>
    "tpu.trace_start"() <{level = 10 : i32, message = "bqd,bkd->bqk"}> : () -> ()
    %cst_26 = arith.constant dense<0.000000e+00> : vector<2x8x8xf32>
    %37 = tpu.matmul %34, %35, %cst_26 {dimension_numbers = #tpu.dot_dimension_numbers<[2], [2], [1], [1], [0, 0, 0, 1, 1, 1], [0], [0]>} : vector<2x8x8xbf16>, vector<2x8x8xbf16>, vector<2x8x8xf32> -> vector<2x8x8xf32>
    "tpu.trace_stop"() : () -> ()
    %cst_27 = arith.constant dense<0xFF800000> : vector<2x8xf32>
    %38 = vector.multi_reduction <maximumf>, %37, %cst_27 [2] : vector<2x8x8xf32> to vector<2x8xf32>
    %39 = vector.shape_cast %38 : vector<2x8xf32> to vector<2x8x1xf32>
    %40 = vector.broadcast %39 : vector<2x8x1xf32> to vector<2x8x8xf32>
    %41 = arith.subf %37, %40 : vector<2x8x8xf32>
    %42 = math.exp %41 : vector<2x8x8xf32>
    %cst_28 = arith.constant dense<0.000000e+00> : vector<2x8xf32>
    %43 = vector.multi_reduction <add>, %42, %cst_28 [2] : vector<2x8x8xf32> to vector<2x8xf32>
    %44 = vector.shape_cast %43 : vector<2x8xf32> to vector<2x8x1xf32>
    %45 = tpu.reciprocal %44 {approx = true} : vector<2x8x1xf32> -> vector<2x8x1xf32>
    %46 = vector.broadcast %45 : vector<2x8x1xf32> to vector<2x8x8xf32>
    %47 = arith.mulf %42, %46 : vector<2x8x8xf32>
    %48 = arith.truncf %47 : vector<2x8x8xf32> to vector<2x8x8xbf16>
    "tpu.trace_start"() <{level = 10 : i32, message = "bqk,bkd->bqd"}> : () -> ()
    %cst_29 = arith.constant dense<0.000000e+00> : vector<2x8x8xf32>
    %49 = tpu.matmul %48, %36, %cst_29 {dimension_numbers = #tpu.dot_dimension_numbers<[2], [1], [1], [2], [0, 0, 0, 1, 1, 2], [0], [0]>} : vector<2x8x8xbf16>, vector<2x8x8xbf16>, vector<2x8x8xf32> -> vector<2x8x8xf32>
    "tpu.trace_stop"() : () -> ()
    %50 = arith.truncf %49 : vector<2x8x8xf32> to vector<2x8x8xbf16>
    %51 = vector.extract_strided_slice %29 {offsets = [0, 0, 8], sizes = [2, 8, 8], strides = [1, 1, 1]} : vector<2x8x32xbf16> to vector<2x8x8xbf16>
    %52 = vector.extract_strided_slice %31 {offsets = [0, 0, 8], sizes = [2, 8, 8], strides = [1, 1, 1]} : vector<2x8x32xbf16> to vector<2x8x8xbf16>
    %53 = vector.extract_strided_slice %33 {offsets = [0, 0, 8], sizes = [2, 8, 8], strides = [1, 1, 1]} : vector<2x8x32xbf16> to vector<2x8x8xbf16>
    "tpu.trace_start"() <{level = 10 : i32, message = "bqd,bkd->bqk"}> : () -> ()
    %cst_30 = arith.constant dense<0.000000e+00> : vector<2x8x8xf32>
    %54 = tpu.matmul %51, %52, %cst_30 {dimension_numbers = #tpu.dot_dimension_numbers<[2], [2], [1], [1], [0, 0, 0, 1, 1, 1], [0], [0]>} : vector<2x8x8xbf16>, vector<2x8x8xbf16>, vector<2x8x8xf32> -> vector<2x8x8xf32>
    "tpu.trace_stop"() : () -> ()
    %cst_31 = arith.constant dense<0xFF800000> : vector<2x8xf32>
    %55 = vector.multi_reduction <maximumf>, %54, %cst_31 [2] : vector<2x8x8xf32> to vector<2x8xf32>
    %56 = vector.shape_cast %55 : vector<2x8xf32> to vector<2x8x1xf32>
    %57 = vector.broadcast %56 : vector<2x8x1xf32> to vector<2x8x8xf32>
    %58 = arith.subf %54, %57 : vector<2x8x8xf32>
    %59 = math.exp %58 : vector<2x8x8xf32>
    %cst_32 = arith.constant dense<0.000000e+00> : vector<2x8xf32>
    %60 = vector.multi_reduction <add>, %59, %cst_32 [2] : vector<2x8x8xf32> to vector<2x8xf32>
    %61 = vector.shape_cast %60 : vector<2x8xf32> to vector<2x8x1xf32>
    %62 = tpu.reciprocal %61 {approx = true} : vector<2x8x1xf32> -> vector<2x8x1xf32>
    %63 = vector.broadcast %62 : vector<2x8x1xf32> to vector<2x8x8xf32>
    %64 = arith.mulf %59, %63 : vector<2x8x8xf32>
    %65 = arith.truncf %64 : vector<2x8x8xf32> to vector<2x8x8xbf16>
    "tpu.trace_start"() <{level = 10 : i32, message = "bqk,bkd->bqd"}> : () -> ()
    %cst_33 = arith.constant dense<0.000000e+00> : vector<2x8x8xf32>
    %66 = tpu.matmul %65, %53, %cst_33 {dimension_numbers = #tpu.dot_dimension_numbers<[2], [1], [1], [2], [0, 0, 0, 1, 1, 2], [0], [0]>} : vector<2x8x8xbf16>, vector<2x8x8xbf16>, vector<2x8x8xf32> -> vector<2x8x8xf32>
    "tpu.trace_stop"() : () -> ()
    %67 = arith.truncf %66 : vector<2x8x8xf32> to vector<2x8x8xbf16>
    %68 = vector.extract_strided_slice %29 {offsets = [0, 0, 16], sizes = [2, 8, 8], strides = [1, 1, 1]} : vector<2x8x32xbf16> to vector<2x8x8xbf16>
    %69 = vector.extract_strided_slice %31 {offsets = [0, 0, 16], sizes = [2, 8, 8], strides = [1, 1, 1]} : vector<2x8x32xbf16> to vector<2x8x8xbf16>
    %70 = vector.extract_strided_slice %33 {offsets = [0, 0, 16], sizes = [2, 8, 8], strides = [1, 1, 1]} : vector<2x8x32xbf16> to vector<2x8x8xbf16>
    "tpu.trace_start"() <{level = 10 : i32, message = "bqd,bkd->bqk"}> : () -> ()
    %cst_34 = arith.constant dense<0.000000e+00> : vector<2x8x8xf32>
    %71 = tpu.matmul %68, %69, %cst_34 {dimension_numbers = #tpu.dot_dimension_numbers<[2], [2], [1], [1], [0, 0, 0, 1, 1, 1], [0], [0]>} : vector<2x8x8xbf16>, vector<2x8x8xbf16>, vector<2x8x8xf32> -> vector<2x8x8xf32>
    "tpu.trace_stop"() : () -> ()
    %cst_35 = arith.constant dense<0xFF800000> : vector<2x8xf32>
    %72 = vector.multi_reduction <maximumf>, %71, %cst_35 [2] : vector<2x8x8xf32> to vector<2x8xf32>
    %73 = vector.shape_cast %72 : vector<2x8xf32> to vector<2x8x1xf32>
    %74 = vector.broadcast %73 : vector<2x8x1xf32> to vector<2x8x8xf32>
    %75 = arith.subf %71, %74 : vector<2x8x8xf32>
    %76 = math.exp %75 : vector<2x8x8xf32>
    %cst_36 = arith.constant dense<0.000000e+00> : vector<2x8xf32>
    %77 = vector.multi_reduction <add>, %76, %cst_36 [2] : vector<2x8x8xf32> to vector<2x8xf32>
    %78 = vector.shape_cast %77 : vector<2x8xf32> to vector<2x8x1xf32>
    %79 = tpu.reciprocal %78 {approx = true} : vector<2x8x1xf32> -> vector<2x8x1xf32>
    %80 = vector.broadcast %79 : vector<2x8x1xf32> to vector<2x8x8xf32>
    %81 = arith.mulf %76, %80 : vector<2x8x8xf32>
    %82 = arith.truncf %81 : vector<2x8x8xf32> to vector<2x8x8xbf16>
    "tpu.trace_start"() <{level = 10 : i32, message = "bqk,bkd->bqd"}> : () -> ()
    %cst_37 = arith.constant dense<0.000000e+00> : vector<2x8x8xf32>
    %83 = tpu.matmul %82, %70, %cst_37 {dimension_numbers = #tpu.dot_dimension_numbers<[2], [1], [1], [2], [0, 0, 0, 1, 1, 2], [0], [0]>} : vector<2x8x8xbf16>, vector<2x8x8xbf16>, vector<2x8x8xf32> -> vector<2x8x8xf32>
    "tpu.trace_stop"() : () -> ()
    %84 = arith.truncf %83 : vector<2x8x8xf32> to vector<2x8x8xbf16>
    %85 = vector.extract_strided_slice %29 {offsets = [0, 0, 24], sizes = [2, 8, 8], strides = [1, 1, 1]} : vector<2x8x32xbf16> to vector<2x8x8xbf16>
    %86 = vector.extract_strided_slice %31 {offsets = [0, 0, 24], sizes = [2, 8, 8], strides = [1, 1, 1]} : vector<2x8x32xbf16> to vector<2x8x8xbf16>
    %87 = vector.extract_strided_slice %33 {offsets = [0, 0, 24], sizes = [2, 8, 8], strides = [1, 1, 1]} : vector<2x8x32xbf16> to vector<2x8x8xbf16>
    "tpu.trace_start"() <{level = 10 : i32, message = "bqd,bkd->bqk"}> : () -> ()
    %cst_38 = arith.constant dense<0.000000e+00> : vector<2x8x8xf32>
    %88 = tpu.matmul %85, %86, %cst_38 {dimension_numbers = #tpu.dot_dimension_numbers<[2], [2], [1], [1], [0, 0, 0, 1, 1, 1], [0], [0]>} : vector<2x8x8xbf16>, vector<2x8x8xbf16>, vector<2x8x8xf32> -> vector<2x8x8xf32>
    "tpu.trace_stop"() : () -> ()
    %cst_39 = arith.constant dense<0xFF800000> : vector<2x8xf32>
    %89 = vector.multi_reduction <maximumf>, %88, %cst_39 [2] : vector<2x8x8xf32> to vector<2x8xf32>
    %90 = vector.shape_cast %89 : vector<2x8xf32> to vector<2x8x1xf32>
    %91 = vector.broadcast %90 : vector<2x8x1xf32> to vector<2x8x8xf32>
    %92 = arith.subf %88, %91 : vector<2x8x8xf32>
    %93 = math.exp %92 : vector<2x8x8xf32>
    %cst_40 = arith.constant dense<0.000000e+00> : vector<2x8xf32>
    %94 = vector.multi_reduction <add>, %93, %cst_40 [2] : vector<2x8x8xf32> to vector<2x8xf32>
    %95 = vector.shape_cast %94 : vector<2x8xf32> to vector<2x8x1xf32>
    %96 = tpu.reciprocal %95 {approx = true} : vector<2x8x1xf32> -> vector<2x8x1xf32>
    %97 = vector.broadcast %96 : vector<2x8x1xf32> to vector<2x8x8xf32>
    %98 = arith.mulf %93, %97 : vector<2x8x8xf32>
    %99 = arith.truncf %98 : vector<2x8x8xf32> to vector<2x8x8xbf16>
    "tpu.trace_start"() <{level = 10 : i32, message = "bqk,bkd->bqd"}> : () -> ()
    %cst_41 = arith.constant dense<0.000000e+00> : vector<2x8x8xf32>
    %100 = tpu.matmul %99, %87, %cst_41 {dimension_numbers = #tpu.dot_dimension_numbers<[2], [1], [1], [2], [0, 0, 0, 1, 1, 2], [0], [0]>} : vector<2x8x8xbf16>, vector<2x8x8xbf16>, vector<2x8x8xf32> -> vector<2x8x8xf32>
    "tpu.trace_stop"() : () -> ()
    %101 = arith.truncf %100 : vector<2x8x8xf32> to vector<2x8x8xbf16>
    %102 = tpu.concatenate %50, %67, %84, %101 in 2 : vector<2x8x8xbf16>, vector<2x8x8xbf16>, vector<2x8x8xbf16>, vector<2x8x8xbf16> -> vector<2x8x32xbf16>
    %103 = vector.shape_cast %102 : vector<2x8x32xbf16> to vector<16x32xbf16>
    %c0_42 = arith.constant 0 : index
    %c0_43 = arith.constant 0 : index
    %104 = vector.load %arg6[%c0_42, %c0_43] : memref<32x32xbf16, #tpu.memory_space<vmem>>, vector<32x32xbf16>
    %cst_44 = arith.constant dense<0.000000e+00> : vector<16x32xf32>
    %105 = tpu.matmul %103, %104, %cst_44 {dimension_numbers = #tpu.dot_dimension_numbers<[1], [0], [0], [1], [0, 0, 1, 1], [], []>} : vector<16x32xbf16>, vector<32x32xbf16>, vector<16x32xf32> -> vector<16x32xf32>
    %c3 = arith.constant 3 : index
    %c0_45 = arith.constant 0 : index
    %c0_46 = arith.constant 0 : index
    %106 = vector.load %arg7[%c3, %c0_45, %c0_46] : memref<4x1x32xf32, #tpu.memory_space<vmem>>, vector<1x1x32xf32>
    %107 = vector.shape_cast %106 : vector<1x1x32xf32> to vector<1x32xf32>
    %108 = vector.broadcast %107 : vector<1x32xf32> to vector<16x32xf32>
    %109 = arith.addf %105, %108 : vector<16x32xf32>
    %110 = vector.shape_cast %109 : vector<16x32xf32> to vector<2x8x32xf32>
    %c0_47 = arith.constant 0 : index
    %c0_48 = arith.constant 0 : index
    %c0_49 = arith.constant 0 : index
    %111 = vector.load %arg8[%c0_47, %c0_48, %c0_49] : memref<2x8x32xf32, #tpu.memory_space<vmem>>, vector<2x8x32xf32>
    tpu.vector_store %arg8[%c0_47, %c0_48, %c0_49], %110 {strides = array<i32>} : memref<2x8x32xf32, #tpu.memory_space<vmem>>, vector<2x8x32xf32>,
    return
  }
  func.func @transform_0(%arg0: i32) -> (i32, i32, i32) {
    %c0_i32 = arith.constant 0 : i32
    %c0_i32_0 = arith.constant 0 : i32
    %c0_i32_1 = arith.constant 0 : i32
    %c0_i32_2 = arith.constant 0 : i32
    return %c0_i32, %c0_i32_0, %c0_i32_1 : i32, i32, i32
  }
  func.func @transform_1(%arg0: i32) -> (i32, i32, i32) {
    %c0_i32 = arith.constant 0 : i32
    %c0_i32_0 = arith.constant 0 : i32
    %c0_i32_1 = arith.constant 0 : i32
    %c0_i32_2 = arith.constant 0 : i32
    return %c0_i32, %c0_i32_0, %c0_i32_1 : i32, i32, i32
  }
  func.func @transform_2(%arg0: i32) -> (i32, i32, i32) {
    %c0_i32 = arith.constant 0 : i32
    %c0_i32_0 = arith.constant 0 : i32
    %c0_i32_1 = arith.constant 0 : i32
    %c0_i32_2 = arith.constant 0 : i32
    return %c0_i32, %c0_i32_0, %c0_i32_1 : i32, i32, i32
  }
  func.func @transform_3(%arg0: i32) -> (i32, i32) {
    %c0_i32 = arith.constant 0 : i32
    %c0_i32_0 = arith.constant 0 : i32
    %c0_i32_1 = arith.constant 0 : i32
    return %c0_i32, %c0_i32_0 : i32, i32
  }
  func.func @transform_4(%arg0: i32) -> (i32, i32, i32) {
    %c0_i32 = arith.constant 0 : i32
    %c0_i32_0 = arith.constant 0 : i32
    %c0_i32_1 = arith.constant 0 : i32
    %c0_i32_2 = arith.constant 0 : i32
    return %c0_i32, %c0_i32_0, %c0_i32_1 : i32, i32, i32
  }
  func.func @transform_5(%arg0: i32) -> (i32, i32) {
    %c0_i32 = arith.constant 0 : i32
    %c0_i32_0 = arith.constant 0 : i32
    %c0_i32_1 = arith.constant 0 : i32
    return %c0_i32, %c0_i32_0 : i32, i32
  }
  func.func @transform_6(%arg0: i32) -> (i32, i32, i32) {
    %c0_i32 = arith.constant 0 : i32
    %c0_i32_0 = arith.constant 0 : i32
    %c0_i32_1 = arith.constant 0 : i32
    %c0_i32_2 = arith.constant 0 : i32
    return %c0_i32, %c0_i32_0, %c0_i32_1 : i32, i32, i32
  }
  func.func @transform_7(%arg0: i32) -> (i32, i32, i32) {
    %c0_i32 = arith.constant 0 : i32
    %c0_i32_0 = arith.constant 0 : i32
    %c0_i32_1 = arith.constant 0 : i32
    %c0_i32_2 = arith.constant 0 : i32
    return %c0_i32, %c0_i32_0, %c0_i32_1 : i32, i32, i32
  }
}

</mosaic_0001>

<bundles_post_ra>
// kernel: tpu_custom_call.1
= control target key start
LH: loop header
LB: loop body
LE: loop exit
PB: predicated region body
PF: predicated region fallthrough
CT: control target
= control target key end

     0   :  { %12 = vsyncpa [#allocation3], 0  ;;  %s2140_s0 = inlined_call_operand.hbm [shape: bf16[2,8,32], index: 0, kind: input, shape index: {}]   ;;  %s2141_s1 = inlined_call_operand.hbm [shape: bf16[2,8,32], index: 1, kind: input, shape index: {}]   ;;  %s2142_s2 = inlined_call_operand.hbm [shape: bf16[2,8,32], index: 2, kind: input, shape index: {}]   ;;  %s2143_s3 = inlined_call_operand.hbm [shape: bf16[32,32], index: 3, kind: input, shape index: {}]   ;;  %s2144_s4 = inlined_call_operand.hbm [shape: bf16[2,32,32], index: 4, kind: input, shape index: {}]   ;;  %s2145_s5 = inlined_call_operand.vmem [shape: bf16[32,32], index: 5, kind: input, shape index: {}]   ;;  %s2146_s6 = inlined_call_operand.vmem [shape: f32[4,1,32], index: 6, kind: input, shape index: {}]   ;;  %s2147_s7 = inlined_call_operand.hbm [shape: f32[2,8,32], index: 7, kind: output, shape index: {}]  }
   0x1   :  { %13 = vsyncpa [#allocation6], 0 }
   0x2   :  { %14 = vsyncpa [#allocation9], 0 }
   0x3   :  { %15 = vsyncpa [#allocation4], 0  ;;  %s1771_s24 = smov [#allocation5]   ;;  %s1772_s26 = smov [#allocation8]  }
   0x4   :  { %s33_s25 = sshll.u32 %s1771_s24, 4  ;;  %s57_s27 = sshll.u32 %s1772_s26, 4  ;;  %s34_s25 = int_to_ptr.vmem [resolvable:$true] %s33_s25  ;;  %s1828_s27 = int_to_ptr.vmem [resolvable:$true] %s57_s27 }
   0x5   :  { %s1631_s30 = scalar_lea.hbm %s2141_s1, 128 }
   0x6   :  { %p1632_p0 = scmp.ne.s32.totalorder %s2141_s1, %s1631_s30  ;;  %p1635_p1 = scmp.lt.u32.totalorder %s1631_s30, %s2141_s1 }
   0x8   :  { %p1637_p2 = pnand %p1635_p1, %p1632_p0 }
   0xa   :  { %1640 = shalt.err (!%p1637_p2)
}
   0xb   :  { %s1641_s12 = scalar_lea.vmem %s34_s25, 128  ;;  %p1646_p4 = scmp.lt.s32.totalorder %s34_s25, %s34_s25 }
   0xc   :  { %p1642_p3 = scmp.ne.s32.totalorder %s34_s25, %s1641_s12  ;;  %p1647_p5 = scmp.lt.s32.totalorder %s1641_s12, %s1641_s12 }
   0xe   :  { %p1648_p6 = por %p1647_p5, %p1646_p4 }
  0x10   :  { %p1649_p7 = pnand %p1648_p6, %p1642_p3 }
  0x12   :  { %1652 = shalt.err (!%p1649_p7)
}
  0x13   :  { %s1773_s13 = smov 64   ;;  %s1774_s14 = smov 4  }
  0x14   :  { %39 = dma.hbm_to_vmem [thread:$0]  %s2141_s1, 128, %s34_s25, [#allocation6], %s1773_s13, %s1773_s13, %s1774_s14  }
  0x15   :  { %s1653_s19 = scalar_lea.hbm %s2143_s3, 256 }
  0x16   :  { %p1654_p8 = scmp.ne.s32.totalorder %s2143_s3, %s1653_s19  ;;  %p1657_p9 = scmp.lt.u32.totalorder %s1653_s19, %s2143_s3 }
  0x18   :  { %p1659_p10 = pnand %p1657_p9, %p1654_p8 }
  0x1a   :  { %1662 = shalt.err (!%p1659_p10)
}
  0x1b   :  { %s1663_s24 = scalar_lea.vmem %s1828_s27, 256  ;;  %p1668_p12 = scmp.lt.s32.totalorder %s1828_s27, %s1828_s27 }
  0x1c   :  { %p1664_p11 = scmp.ne.s32.totalorder %s1828_s27, %s1663_s24  ;;  %p1669_p13 = scmp.lt.s32.totalorder %s1663_s24, %s1663_s24 }
  0x1e   :  { %p1670_p0 = por %p1669_p13, %p1668_p12 }
  0x20   :  { %p1671_p1 = pnand %p1670_p0, %p1664_p11 }
  0x22   :  { %1674 = shalt.err (!%p1671_p1)
}
  0x23   :  { %63 = dma.hbm_to_vmem [thread:$0]  %s2143_s3, 256, %s1828_s27, [#allocation9], %s1773_s13, %s1773_s13, %s1774_s14  }
  0x24   :  { %s1775_s26 = smov [#allocation2]   ;;  %s1776_s29 = smov [#allocation7]  }
  0x25   :  { %s21_s28 = sshll.u32 %s1775_s26, 4  ;;  %s45_s30 = sshll.u32 %s1776_s29, 4  ;;  %s22_s28 = int_to_ptr.vmem [resolvable:$true] %s21_s28  ;;  %s1865_s30 = int_to_ptr.vmem [resolvable:$true] %s45_s30 }
  0x26   :  { %s1675_s10 = scalar_lea.hbm %s2140_s0, 128 }
  0x27   :  { %p1676_p2 = scmp.ne.s32.totalorder %s2140_s0, %s1675_s10  ;;  %p1679_p3 = scmp.lt.u32.totalorder %s1675_s10, %s2140_s0 }
  0x29   :  { %p1681_p4 = pnand %p1679_p3, %p1676_p2 }
  0x2b   :  { %1684 = shalt.err (!%p1681_p4)
}
  0x2c   :  { %s1685_s3 = scalar_lea.vmem %s22_s28, 128  ;;  %p1690_p6 = scmp.lt.s32.totalorder %s22_s28, %s22_s28 }
  0x2d   :  { %p1686_p5 = scmp.ne.s32.totalorder %s22_s28, %s1685_s3  ;;  %p1691_p7 = scmp.lt.s32.totalorder %s1685_s3, %s1685_s3 }
  0x2f   :  { %p1692_p8 = por %p1691_p7, %p1690_p6 }
  0x31   :  { %p1693_p9 = pnand %p1692_p8, %p1686_p5 }
  0x33   :  { %1696 = shalt.err (!%p1693_p9)
}
  0x34   :  { %27 = dma.hbm_to_vmem [thread:$0]  %s2140_s0, 128, %s22_s28, [#allocation3], %s1773_s13, %s1773_s13, %s1774_s14  }
  0x35   :  { %s1697_s20 = scalar_lea.hbm %s2142_s2, 128 }
  0x36   :  { %p1698_p10 = scmp.ne.s32.totalorder %s2142_s2, %s1697_s20  ;;  %p1701_p11 = scmp.lt.u32.totalorder %s1697_s20, %s2142_s2 }
  0x38   :  { %p1703_p12 = pnand %p1701_p11, %p1698_p10 }
  0x3a   :  { %1706 = shalt.err (!%p1703_p12)
}
  0x3b   :  { %s1707_s1 = scalar_lea.vmem %s1865_s30, 128  ;;  %p1712_p0 = scmp.lt.s32.totalorder %s1865_s30, %s1865_s30 }
  0x3c   :  { %p1708_p13 = scmp.ne.s32.totalorder %s1865_s30, %s1707_s1  ;;  %p1713_p1 = scmp.lt.s32.totalorder %s1707_s1, %s1707_s1 }
  0x3e   :  { %p1714_p2 = por %p1713_p1, %p1712_p0 }
  0x40   :  { %p1715_p3 = pnand %p1714_p2, %p1708_p13 }
  0x42   :  { %1718 = shalt.err (!%p1715_p3)
}
  0x43   :  { %51 = dma.hbm_to_vmem [thread:$0]  %s2142_s2, 128, %s1865_s30, [#allocation6], %s1773_s13, %s1773_s13, %s1774_s14  }
  0x44   :  { %s1777_s26 = smov [#allocation10]   ;;  %s1719_s9 = scalar_lea.hbm %s2144_s4, 512 }
  0x45   :  { %s69_s28 = sshll.u32 %s1777_s26, 4  ;;  %p1720_p4 = scmp.ne.s32.totalorder %s2144_s4, %s1719_s9  ;;  %s70_s28 = int_to_ptr.vmem [resolvable:$true] %s69_s28 }
  0x46   :  { %p1723_p5 = scmp.lt.u32.totalorder %s1719_s9, %s2144_s4 }
  0x48   :  { %p1725_p6 = pnand %p1723_p5, %p1720_p4 }
  0x4a   :  { %1728 = shalt.err (!%p1725_p6)
}
  0x4b   :  { %s1729_s16 = scalar_lea.vmem %s70_s28, 512  ;;  %p1734_p8 = scmp.lt.s32.totalorder %s70_s28, %s70_s28 }
  0x4c   :  { %p1730_p7 = scmp.ne.s32.totalorder %s70_s28, %s1729_s16  ;;  %p1735_p9 = scmp.lt.s32.totalorder %s1729_s16, %s1729_s16 }
  0x4e   :  { %p1736_p10 = por %p1735_p9, %p1734_p8 }
  0x50   :  { %p1737_p11 = pnand %p1736_p10, %p1730_p7 }
  0x52   :  { %1740 = shalt.err (!%p1737_p11)
}
  0x53   :  { %75 = dma.hbm_to_vmem [thread:$0]  %s2144_s4, 512, %s70_s28, [#allocation9], %s1773_s13, %s1773_s13, %s1774_s14  }
  0x54   :  { %1763 = dma.done.wait [#allocation3], 128  }
  0x55   :  { %1764 = vsyncadd [#allocation3], 4294967168 }
  0x56   :  { %1765 = dma.done.wait [#allocation6], 256  }
  0x57   :  { %1766 = vsyncadd [#allocation6], 4294967040 }
  0x58   :  { %1767 = dma.done.wait [#allocation9], 768  }
  0x59   :  { %1768 = vsyncadd [#allocation9], 4294966528  ;;  %v1778_v0 = vmov 0.0   ;;  %vm1779_vm0 = vmmov 0   ;;  %v1588_v1 = vld [vmem:[#allocation10] sm:$0xff]   ;;  %v1589_v2 = vld [vmem:[#allocation8] sm:$0xff]  }
  0x5a   :  { %1451 = vmatprep.subr.bf16.mxu1 %v1778_v0  ;;  %1443 = vmatprep.subr.bf16.mxu0 %v1778_v0  ;;  %v1590_v3 = vld [vmem:[#allocation10 + $0x8] sm:$0xff]   ;;  %v1591_v4 = vld [vmem:[#allocation8 + $0x8] sm:$0xff]   ;;  %v1592_v5 = vld [vmem:[#allocation5] sm:$0xff]   ;;  %vm130_vm1 = vcmask 261120   ;;  %vm342_vm2 = vcmask 64512   ;;  %s1780_s27 = smov 120  }
  0x5b   :  { %1455 = vmatprep.mubr.msk.bf16.mxu1 %vm1779_vm0, %v1778_v0  ;;  %1447 = vmatprep.mubr.msk.bf16.mxu0 %vm1779_vm0, %v1778_v0  ;;  %v1593_v6 = vld [vmem:[#allocation2] sm:$0xff]   ;;  %v1594_v7 = vld [vmem:[#allocation10 + $0x10] sm:$0xff]   ;;  %v1596_v9 = vld [vmem:[#allocation7] sm:$0xff]   ;;  %vm462_vm3 = vcmask 1043456   ;;  %s1781_s19 = smov 112   ;;  %s1782_s20 = smov 104  }
  0x5c   :  { %1452 = vmatpush3.bf16.msra.mxu1 %v1588_v1  ;;  %1444 = vmatpush3.bf16.msra.mxu0 %v1589_v2  ;;  %v1595_v8 = vld [vmem:[#allocation10 + $0x18] sm:$0xff]   ;;  %v1354_v10 = vld [vmem:[%s2146_s6 + $0x1] ss:$0 sm:$0xff]  ;;  %v1348_v11 = vld [vmem:[%s2146_s6] ss:$0 sm:$0xff]  ;;  %s1783_s21 = smov 8  }
  0x5d   :  { %1453 = vmatprep.subr.bf16.mxu1 %v1778_v0  ;;  %1445 = vmatprep.subr.bf16.mxu0 %v1778_v0  ;;  %v1360_v32 = vld [vmem:[%s2146_s6 + $0x2] ss:$0 sm:$0xff]  ;;  %s1784_s22 = smov 16   ;;  %s1785_s25 = smov 24   ;;  %vm1244_vm4 = vcmask 130048   ;;  %vm1249_vm5 = vcmask 195584  }
  0x5e   :  { %s1786_s28 = smov [#allocation11]  }
  0x5f   :  { %s1334_s29 = sshll.u32 %s1786_s28, 4  ;;  %s1335_s29 = int_to_ptr.vmem [resolvable:$true] %s1334_s29 }
  0x60   :  { %1454 = vmatpush3.bf16.msra.mxu1 %v1590_v3  ;;  %1446 = vmatpush3.bf16.msra.mxu0 %v1591_v4  ;;  %s1741_s8 = scalar_lea.vmem %s1335_s29, 256  ;;  %p1746_p13 = scmp.lt.s32.totalorder %s1335_s29, %s1335_s29 }
  0x61   :  { %1467 = vmatprep.subr.bf16.mxu1 %v1778_v0  ;;  %1459 = vmatprep.subr.bf16.mxu0 %v1778_v0  ;;  %p1742_p12 = scmp.ne.s32.totalorder %s1335_s29, %s1741_s8  ;;  %p1747_p0 = scmp.lt.s32.totalorder %s1741_s8, %s1741_s8 }
  0x63   :  { %1456 = vmatmul.mubr.msk.bf16.vlgmr.msra.gmra.mrb[0].mxu1 %vm130_vm1, %v1592_v5  ;;  %1448 = vmatmul.mubr.msk.bf16.vlgmr.msra.gmra.mrb[0].mxu0 %vm130_vm1, %v1593_v6  ;;  %p1748_p1 = por %p1747_p0, %p1746_p13 }
  0x64   :  { %1469 = vmatprep.mubr.msk.bf16.mxu1 %vm1779_vm0, %v1778_v0  ;;  %1460 = vmatpush3.bf16.msra.mxu0 %v1594_v7 }
  0x65   :  { %1463 = vmatprep.mubr.msk.bf16.mxu0 %vm1779_vm0, %v1778_v0  ;;  %1461 = vmatprep.subr.bf16.mxu0 %v1778_v0  ;;  %p1749_p2 = pnand %p1748_p1, %p1742_p12 }
  0x68   :  { %1462 = vmatpush3.bf16.msra.mxu0 %v1595_v8 }
  0x69   :  { %1473 = vmatprep.subr.bf16.mxu0 %v1778_v0 }
  0x6b   :  { %1464 = vmatmul.mubr.msk.bf16.vlgmr.msra.gmra.mrb[4].mxu0 %vm130_vm1, %v1596_v9 }
  0x6c   :  { %1475 = vmatprep.mubr.msk.bf16.mxu0 %vm1779_vm0, %v1778_v0 }
 0x136   :  { %v241_v12 = vpop.f32.mrb[0].mxu1  ;;  %v168_v15 = vpop.f32.mrb[0].mxu0 }
 0x137   :  { %v242_v13 = vadd.f32 %v1354_v10, %v241_v12  ;;  %v1457_v14 = vpop.f32.mrb[1].mxu1  ;;  %v169_v17 = vadd.f32 %v1348_v11, %v168_v15  ;;  %v1449_v18 = vpop.f32.mrb[1].mxu0 }
 0x138   :  { %v244_v16 = vpop.f32.mrb[2].mxu1  ;;  %v171_v22 = vpop.f32.mrb[2].mxu0 }
 0x139   :  { %v1944_v19 = vpack.c.bf16 %v242_v13, %v242_v13  ;;  %v245_v20 = vadd.f32 %v1354_v10, %v244_v16  ;;  %v1458_v21 = vpop.f32.mrb[3].mxu1  ;;  %v1450_v23 = vpop.f32.mrb[3].mxu0  ;;  %v322_v25 = vmul.f32 0.5, %v169_v17  ;;  %v172_v26 = vadd.f32 %v1348_v11, %v171_v22 }
 0x13b   :  { %v1946_v24 = vpack.c.bf16 %v245_v20, %v245_v20  ;;  %v347_v27 = vsel %vm342_vm2, %v1944_v19, 0  ;;  %v1955_v29 = vpack.c.bf16 %v322_v25, %v322_v25  ;;  %v323_v30 = vmul.f32 0.5, %v172_v26 }
 0x13c   :  { %1468 = vmatpush3.bf16.xpose.msra.mxu1 %v347_v27 }
 0x13d   :  { %606 = vrot.lane.b32.xlu1 %v1946_v24, %s1780_s27  ;;  %v393_v28 = vsel %vm342_vm2, %v1946_v24, 0  ;;  %1479 = vmatprep.subr.bf16.mxu1 %v1778_v0  ;;  %v1958_v31 = vpack.c.bf16 %v323_v30, %v323_v30 }
 0x13e   :  { %1474 = vmatpush3.bf16.xpose.msra.mxu0 %v393_v28  ;;  %v315_v33 = vpop.f32.mrb[4].mxu0 }
 0x13f   :  { %1485 = vmatprep.subr.bf16.mxu0 %v1778_v0  ;;  %v316_v34 = vadd.f32 %v1360_v32, %v315_v33  ;;  %v1465_v35 = vpop.f32.mrb[5].mxu0 }
 0x140   :  { %v318_v36 = vpop.f32.mrb[6].mxu0 }
 0x141   :  { %v319_v37 = vadd.f32 %v1360_v32, %v318_v36  ;;  %v1466_v38 = vpop.f32.mrb[7].mxu0  ;;  %v1971_v39 = vpack.c.bf16 %v316_v34, %v316_v34 }
 0x143   :  { %1470 = vmatmul.mubr.msk.bf16.vlgmr.msra.gmra.mrb[4].mxu1 %vm342_vm2, %v1955_v29  ;;  %v1973_v40 = vpack.c.bf16 %v319_v37, %v319_v37  ;;  %v464_v41 = vsel %vm462_vm3, %v1971_v39, 0 }
 0x144   :  { %1481 = vmatprep.mubr.msk.bf16.mxu1 %vm1779_vm0, %v1778_v0  ;;  %1480 = vmatpush3.bf16.msra.mxu1 %v464_v41 }
 0x145   :  { %1476 = vmatmul.mubr.msk.bf16.vlgmr.msra.gmra.mrb[8].mxu0 %vm342_vm2, %v1958_v31  ;;  %v510_v42 = vsel %vm462_vm3, %v1973_v40, 0  ;;  %1491 = vmatprep.subr.bf16.mxu1 %v1778_v0 }
 0x146   :  { %1487 = vmatprep.mubr.msk.bf16.mxu0 %vm1779_vm0, %v1778_v0  ;;  %1486 = vmatpush3.bf16.msra.mxu0 %v510_v42 }
 0x147   :  { %1497 = vmatprep.subr.bf16.mxu0 %v1778_v0 }
 0x1af   :  { %v607_v63 = vpop.permute.xlu1 %606 }
 0x1b0   :  { %v612_v11 = vsel %vm342_vm2, %v607_v63, 0 }
 0x216   :  { %v383_v43 = vpop.f32.mrb[4].mxu1 }
 0x217   :  { %v1471_v44 = vpop.f32.mrb[5].mxu1  ;;  %v435_v45 = vsel %vm342_vm2, %v383_v43, -inf }
 0x218   :  { %436 = vmax.xlane.f32.xlu0 %v435_v45  ;;  %v386_v46 = vpop.f32.mrb[6].mxu1  ;;  %v429_v47 = vpop.f32.mrb[8].mxu0 }
 0x219   :  { %v1472_v48 = vpop.f32.mrb[7].mxu1  ;;  %v1477_v49 = vpop.f32.mrb[9].mxu0  ;;  %v438_v52 = vsel %vm342_vm2, %v429_v47, -inf }
 0x21a   :  { %v432_v50 = vpop.f32.mrb[10].mxu0 }
 0x21b   :  { %v1478_v51 = vpop.f32.mrb[11].mxu0 }
 0x21c   :  { %439 = vmax.xlane.f32.xlu0 %v438_v52 }
 0x232   :  { %556 = vrot.lane.b32.xlu0 %v1944_v19, %s1780_s27 }
 0x2a5   :  { %v437_v53 = vpop.xlane.xlu0 %436 }
 0x2a6   :  { %v441_v54 = vsub.f32 %v383_v43, %v437_v53 }
 0x2a8   :  { %v443_v55 = vmul.f32 1.442695, %v441_v54 }
 0x2a9   :  { %v440_v56 = vpop.xlane.xlu0 %439 }
 0x2aa   :  { %1599 = vpow2.f32 %v443_v55  ;;  %v442_v57 = vsub.f32 %v429_v47, %v440_v56 }
 0x2ac   :  { %v445_v58 = vmul.f32 1.442695, %v442_v57 }
 0x2ad   :  { %v557_v5 = vpop.permute.xlu0 %556 }
 0x2ae   :  { %1601 = vpow2.f32 %v445_v58  ;;  %v562_v8 = vsel %vm342_vm2, %v557_v5, 0 }
 0x2b4   :  { %v1600_v59 = vpop.eup %1599 }
 0x2b5   :  { %v447_v60 = vsel %vm342_vm2, %v1600_v59, 0.0 }
 0x2b6   :  { %448 = vadd.xlane.f32.xlu1 %v447_v60 }
 0x2b8   :  { %v1602_v61 = vpop.eup %1601 }
 0x2b9   :  { %v450_v62 = vsel %vm342_vm2, %v1602_v61, 0.0 }
 0x2ba   :  { %451 = vadd.xlane.f32.xlu1 %v450_v62 }
 0x2cb   :  { %554 = vrot.lane.b32.xlu1 %v1955_v29, %s1780_s27 }
 0x2cf   :  { %604 = vrot.lane.b32.xlu1 %v1958_v31, %s1780_s27 }
 0x343   :  { %v449_v1 = vpop.xlane.xlu1 %448 }
 0x344   :  { %1603 = vrcp.f32 %v449_v1 }
 0x347   :  { %v452_v2 = vpop.xlane.xlu1 %451 }
 0x348   :  { %1605 = vrcp.f32 %v452_v2 }
 0x34b   :  { %v555_v12 = vpop.permute.xlu1 %554 }
 0x34e   :  { %v1604_v3 = vpop.eup %1603 }
 0x34f   :  { %v455_v4 = vmul.f32 %v1604_v3, %v1600_v59  ;;  %v605_v13 = vpop.permute.xlu1 %604 }
 0x351   :  { %v457_v6 = vpack.c.bf16 %v455_v4, %v455_v4 }
 0x352   :  { %v1606_v7 = vpop.eup %1605 }
 0x353   :  { %v456_v9 = vmul.f32 %v1606_v7, %v1602_v61  ;;  %1482 = vmatmul.mubr.msk.bf16.vlgmr.msra.gmra.mrb[8].mxu1 %vm342_vm2, %v457_v6 }
 0x354   :  { %1492 = vmatpush3.bf16.xpose.msra.mxu1 %v562_v8  ;;  %1493 = vmatprep.mubr.msk.bf16.mxu1 %vm1779_vm0, %v1778_v0 }
 0x355   :  { %v458_v10 = vpack.c.bf16 %v456_v9, %v456_v9  ;;  %1503 = vmatprep.subr.bf16.mxu1 %v1778_v0 }
 0x357   :  { %1488 = vmatmul.mubr.msk.bf16.vlgmr.msra.gmra.mrb[12].mxu0 %vm342_vm2, %v458_v10 }
 0x358   :  { %1498 = vmatpush3.bf16.xpose.msra.mxu0 %v612_v11  ;;  %1499 = vmatprep.mubr.msk.bf16.mxu0 %vm1779_vm0, %v1778_v0 }
 0x359   :  { %1509 = vmatprep.subr.bf16.mxu0 %v1778_v0 }
 0x35b   :  { %1494 = vmatmul.mubr.msk.bf16.vlgmr.msra.gmra.mrb[12].mxu1 %vm342_vm2, %v555_v12 }
 0x35c   :  { %1505 = vmatprep.mubr.msk.bf16.mxu1 %vm1779_vm0, %v1778_v0 }
 0x35f   :  { %1500 = vmatmul.mubr.msk.bf16.vlgmr.msra.gmra.mrb[16].mxu0 %vm342_vm2, %v605_v13 }
 0x360   :  { %1511 = vmatprep.mubr.msk.bf16.mxu0 %vm1779_vm0, %v1778_v0 }
 0x426   :  { %v2007_v14 = vpop.f32.mrb[8].mxu1 }
 0x427   :  { %v1483_v15 = vpop.f32.mrb[9].mxu1 }
 0x428   :  { %v503_v16 = vpop.f32.mrb[10].mxu1 }
 0x429   :  { %v1484_v17 = vpop.f32.mrb[11].mxu1 }
 0x42a   :  { %v2009_v18 = vpop.f32.mrb[12].mxu0 }
 0x42b   :  { %v1489_v20 = vpop.f32.mrb[13].mxu0 }
 0x42c   :  { %v549_v21 = vpop.f32.mrb[14].mxu0 }
 0x42d   :  { %v1490_v22 = vpop.f32.mrb[15].mxu0 }
 0x42e   :  { %v598_v23 = vpop.f32.mrb[12].mxu1 }
 0x42f   :  { %v1495_v25 = vpop.f32.mrb[13].mxu1  ;;  %v654_v26 = vsel %vm342_vm2, %v598_v23, -inf }
 0x430   :  { %655 = vmax.xlane.f32.xlu0 %v654_v26  ;;  %v601_v27 = vpop.f32.mrb[14].mxu1 }
 0x431   :  { %v1496_v28 = vpop.f32.mrb[15].mxu1 }
 0x432   :  { %v648_v30 = vpop.f32.mrb[16].mxu0 }
 0x433   :  { %v1501_v32 = vpop.f32.mrb[17].mxu0  ;;  %v657_v33 = vsel %vm342_vm2, %v648_v30, -inf }
 0x434   :  { %658 = vmax.xlane.f32.xlu1 %v657_v33  ;;  %v651_v34 = vpop.f32.mrb[18].mxu0 }
 0x435   :  { %v1502_v35 = vpop.f32.mrb[19].mxu0 }
 0x445   :  { %726 = vrot.lane.b32.xlu1 %v1973_v40, %s1780_s27 }
 0x449   :  { %778 = vrot.lane.b32.xlu1 %v1944_v19, %s1781_s19 }
 0x44d   :  { %828 = vrot.lane.b32.xlu1 %v1946_v24, %s1781_s19 }
 0x451   :  { %826 = vrot.lane.b32.xlu1 %v1958_v31, %s1781_s19 }
 0x4bd   :  { %v656_v36 = vpop.xlane.xlu0 %655 }
 0x4be   :  { %v660_v37 = vsub.f32 %v598_v23, %v656_v36 }
 0x4c0   :  { %v662_v38 = vmul.f32 1.442695, %v660_v37 }
 0x4c1   :  { %v659_v41 = vpop.xlane.xlu1 %658 }
 0x4c2   :  { %1607 = vpow2.f32 %v662_v38  ;;  %v661_v42 = vsub.f32 %v648_v30, %v659_v41 }
 0x4c4   :  { %v664_v43 = vmul.f32 1.442695, %v661_v42 }
 0x4c5   :  { %v727_v44 = vpop.permute.xlu1 %726 }
 0x4c6   :  { %1609 = vpow2.f32 %v664_v43  ;;  %v732_v45 = vsel %vm462_vm3, %v727_v44, 0 }
 0x4c7   :  { %1510 = vmatpush3.bf16.msra.mxu0 %v732_v45 }
 0x4c8   :  { %1521 = vmatprep.subr.bf16.mxu0 %v1778_v0 }
 0x4c9   :  { %v779_v55 = vpop.permute.xlu1 %778 }
 0x4ca   :  { %v784_v61 = vsel %vm342_vm2, %v779_v55, 0 }
 0x4cc   :  { %v1608_v46 = vpop.eup %1607 }
 0x4cd   :  { %v666_v47 = vsel %vm342_vm2, %v1608_v46, 0.0  ;;  %v829_v60 = vpop.permute.xlu1 %828 }
 0x4ce   :  { %667 = vadd.xlane.f32.xlu0 %v666_v47  ;;  %v834_v63 = vsel %vm342_vm2, %v829_v60, 0 }
 0x4d0   :  { %v1610_v48 = vpop.eup %1609 }
 0x4d1   :  { %v669_v49 = vsel %vm342_vm2, %v1610_v48, 0.0  ;;  %v827_v2 = vpop.permute.xlu1 %826 }
 0x4d2   :  { %670 = vadd.xlane.f32.xlu0 %v669_v49 }
 0x4e8   :  { %678 = vrot.lane.b32.xlu0 %v1971_v39, %s1780_s27 }
 0x4ec   :  { %776 = vrot.lane.b32.xlu0 %v1955_v29, %s1781_s19 }
 0x55b   :  { %v668_v50 = vpop.xlane.xlu0 %667 }
 0x55c   :  { %1611 = vrcp.f32 %v668_v50 }
 0x55f   :  { %v671_v51 = vpop.xlane.xlu0 %670 }
 0x560   :  { %1613 = vrcp.f32 %v671_v51 }
 0x563   :  { %v679_v52 = vpop.permute.xlu0 %678 }
 0x564   :  { %v684_v53 = vsel %vm462_vm3, %v679_v52, 0 }
 0x565   :  { %1504 = vmatpush3.bf16.msra.mxu1 %v684_v53 }
 0x566   :  { %v1612_v54 = vpop.eup %1611  ;;  %1515 = vmatprep.subr.bf16.mxu1 %v1778_v0 }
 0x567   :  { %v674_v56 = vmul.f32 %v1612_v54, %v1608_v46  ;;  %v777_v1 = vpop.permute.xlu0 %776 }
 0x569   :  { %v676_v57 = vpack.c.bf16 %v674_v56, %v674_v56 }
 0x56a   :  { %v1614_v58 = vpop.eup %1613 }
 0x56b   :  { %v675_v59 = vmul.f32 %v1614_v58, %v1610_v48  ;;  %1506 = vmatmul.mubr.msk.bf16.vlgmr.msra.gmra.mrb[16].mxu1 %vm342_vm2, %v676_v57 }
 0x56c   :  { %1517 = vmatprep.mubr.msk.bf16.mxu1 %vm1779_vm0, %v1778_v0 }
 0x56d   :  { %v677_v62 = vpack.c.bf16 %v675_v59, %v675_v59 }
 0x56e   :  { %1516 = vmatpush3.bf16.xpose.msra.mxu1 %v784_v61 }
 0x56f   :  { %1512 = vmatmul.mubr.msk.bf16.vlgmr.msra.gmra.mrb[20].mxu0 %vm342_vm2, %v677_v62  ;;  %1527 = vmatprep.subr.bf16.mxu1 %v1778_v0 }
 0x570   :  { %1522 = vmatpush3.bf16.xpose.msra.mxu0 %v834_v63  ;;  %1523 = vmatprep.mubr.msk.bf16.mxu0 %vm1779_vm0, %v1778_v0 }
 0x571   :  { %1533 = vmatprep.subr.bf16.mxu0 %v1778_v0 }
 0x575   :  { %1518 = vmatmul.mubr.msk.bf16.vlgmr.msra.gmra.mrb[20].mxu1 %vm342_vm2, %v777_v1 }
 0x576   :  { %1529 = vmatprep.mubr.msk.bf16.mxu1 %vm1779_vm0, %v1778_v0 }
 0x577   :  { %1524 = vmatmul.mubr.msk.bf16.vlgmr.msra.gmra.mrb[24].mxu0 %vm342_vm2, %v827_v2 }
 0x578   :  { %1535 = vmatprep.mubr.msk.bf16.mxu0 %vm1779_vm0, %v1778_v0 }
 0x63e   :  { %v2047_v3 = vpop.f32.mrb[16].mxu1 }
 0x63f   :  { %v1507_v4 = vpop.f32.mrb[17].mxu1 }
 0x640   :  { %v723_v5 = vpop.f32.mrb[18].mxu1 }
 0x641   :  { %v1508_v6 = vpop.f32.mrb[19].mxu1 }
 0x642   :  { %v2049_v7 = vpop.f32.mrb[20].mxu0 }
 0x643   :  { %v1513_v8 = vpop.f32.mrb[21].mxu0 }
 0x644   :  { %v771_v9 = vpop.f32.mrb[22].mxu0 }
 0x645   :  { %v1514_v10 = vpop.f32.mrb[23].mxu0 }
 0x646   :  { %v774_v10 = vpack.c.bf16 %v2047_v3, %v2047_v3 }
 0x648   :  { %v820_v11 = vpop.f32.mrb[20].mxu1 }
 0x649   :  { %v1519_v12 = vpop.f32.mrb[21].mxu1  ;;  %v876_v13 = vsel %vm342_vm2, %v820_v11, -inf }
 0x64a   :  { %877 = vmax.xlane.f32.xlu0 %v876_v13  ;;  %v823_v15 = vpop.f32.mrb[22].mxu1  ;;  %v870_v16 = vpop.f32.mrb[24].mxu0 }
 0x64b   :  { %v1520_v17 = vpop.f32.mrb[23].mxu1  ;;  %v1525_v20 = vpop.f32.mrb[25].mxu0  ;;  %v879_v21 = vsel %vm342_vm2, %v870_v16, -inf }
 0x64c   :  { %880 = vmax.xlane.f32.xlu1 %v879_v21  ;;  %v873_v22 = vpop.f32.mrb[26].mxu0 }
 0x64d   :  { %v1526_v23 = vpop.f32.mrb[27].mxu0 }
 0x65d   :  { %948 = vrot.lane.b32.xlu1 %v1973_v40, %s1781_s19 }
 0x661   :  { %1000 = vrot.lane.b32.xlu1 %v1944_v19, %s1782_s20 }
 0x665   :  { %1050 = vrot.lane.b32.xlu1 %v1946_v24, %s1782_s20 }
 0x669   :  { %1048 = vrot.lane.b32.xlu1 %v1958_v31, %s1782_s20 }
 0x6d7   :  { %v878_v25 = vpop.xlane.xlu0 %877 }
 0x6d8   :  { %v882_v26 = vsub.f32 %v820_v11, %v878_v25  ;;  %v775_v11 = vpack.c.bf16 %v2049_v7, %v2049_v7 }
 0x6d9   :  { %v881_v27 = vpop.xlane.xlu1 %880 }
 0x6da   :  { %v884_v28 = vmul.f32 1.442695, %v882_v26  ;;  %v883_v30 = vsub.f32 %v870_v16, %v881_v27 }
 0x6dc   :  { %1615 = vpow2.f32 %v884_v28  ;;  %v886_v32 = vmul.f32 1.442695, %v883_v30 }
 0x6dd   :  { %v949_v33 = vpop.permute.xlu1 %948 }
 0x6de   :  { %1617 = vpow2.f32 %v886_v32  ;;  %v954_v34 = vsel %vm462_vm3, %v949_v33, 0 }
 0x6df   :  { %1534 = vmatpush3.bf16.msra.mxu0 %v954_v34 }
 0x6e0   :  { %1545 = vmatprep.subr.bf16.mxu0 %v1778_v0 }
 0x6e1   :  { %v1001_v43 = vpop.permute.xlu1 %1000 }
 0x6e5   :  { %v1051_v48 = vpop.permute.xlu1 %1050 }
 0x6e6   :  { %v1616_v19 = vpop.eup %1615  ;;  %v1056_v50 = vsel %vm342_vm2, %v1051_v48, 0 }
 0x6e7   :  { %v888_v24 = vsel %vm342_vm2, %v1616_v19, 0.0 }
 0x6e8   :  { %v1618_v35 = vpop.eup %1617  ;;  %889 = vadd.xlane.f32.xlu0 %v888_v24 }
 0x6e9   :  { %v891_v31 = vsel %vm342_vm2, %v1618_v35, 0.0  ;;  %v1049_v52 = vpop.permute.xlu1 %1048 }
 0x6ec   :  { %892 = vadd.xlane.f32.xlu0 %v891_v31  ;;  %v1597_v31 = vld [vmem:[%s2145_s5] sm:$0xff]  }
 0x702   :  { %900 = vrot.lane.b32.xlu0 %v1971_v39, %s1781_s19 }
 0x706   :  { %998 = vrot.lane.b32.xlu0 %v1955_v29, %s1782_s20  ;;  %v1006_v29 = vsel %vm342_vm2, %v1001_v43, 0 }
 0x775   :  { %v890_v36 = vpop.xlane.xlu0 %889 }
 0x776   :  { %1619 = vrcp.f32 %v890_v36  ;;  %v1598_v36 = vld [vmem:[%s2145_s5 + $0x8] sm:$0xff]  }
 0x779   :  { %v893_v37 = vpop.xlane.xlu0 %892 }
 0x77a   :  { %1621 = vrcp.f32 %v893_v37 }
 0x77d   :  { %v901_v38 = vpop.permute.xlu0 %900 }
 0x77e   :  { %v906_v41 = vsel %vm462_vm3, %v901_v38, 0 }
 0x77f   :  { %1528 = vmatpush3.bf16.msra.mxu1 %v906_v41 }
 0x780   :  { %v1620_v42 = vpop.eup %1619  ;;  %1539 = vmatprep.subr.bf16.mxu1 %v1778_v0 }
 0x781   :  { %v896_v44 = vmul.f32 %v1620_v42, %v1616_v19  ;;  %v999_v51 = vpop.permute.xlu0 %998 }
 0x783   :  { %v898_v45 = vpack.c.bf16 %v896_v44, %v896_v44 }
 0x784   :  { %v1622_v46 = vpop.eup %1621 }
 0x785   :  { %v897_v47 = vmul.f32 %v1622_v46, %v1618_v35  ;;  %1530 = vmatmul.mubr.msk.bf16.vlgmr.msra.gmra.mrb[24].mxu1 %vm342_vm2, %v898_v45 }
 0x786   :  { %1541 = vmatprep.mubr.msk.bf16.mxu1 %vm1779_vm0, %v1778_v0 }
 0x787   :  { %v899_v49 = vpack.c.bf16 %v897_v47, %v897_v47 }
 0x788   :  { %1540 = vmatpush3.bf16.xpose.msra.mxu1 %v1006_v29 }
 0x789   :  { %1536 = vmatmul.mubr.msk.bf16.vlgmr.msra.gmra.mrb[28].mxu0 %vm342_vm2, %v899_v49  ;;  %1551 = vmatprep.subr.bf16.mxu1 %v1778_v0 }
 0x78a   :  { %1546 = vmatpush3.bf16.xpose.msra.mxu0 %v1056_v50  ;;  %1547 = vmatprep.mubr.msk.bf16.mxu0 %vm1779_vm0, %v1778_v0 }
 0x78b   :  { %1557 = vmatprep.subr.bf16.mxu0 %v1778_v0 }
 0x78f   :  { %1542 = vmatmul.mubr.msk.bf16.vlgmr.msra.gmra.mrb[28].mxu1 %vm342_vm2, %v999_v51  ;;  %v552_v51 = vpack.c.bf16 %v2007_v14, %v2007_v14  ;;  %v1388_v14 = vld [vmem:[%s2146_s6 + $0x3] ss:$0 sm:$0xff] }
 0x790   :  { %1553 = vmatprep.mubr.msk.bf16.mxu1 %vm1779_vm0, %v1778_v0 }
 0x791   :  { %1548 = vmatmul.mubr.msk.bf16.vlgmr.msra.gmra.mrb[32].mxu0 %vm342_vm2, %v1049_v52  ;;  %v553_v52 = vpack.c.bf16 %v2009_v18, %v2009_v18 }
 0x792   :  { %1559 = vmatprep.mubr.msk.bf16.mxu0 %vm1779_vm0, %v1778_v0 }
 0x858   :  { %v942_v53 = vpop.f32.mrb[24].mxu1 }
 0x859   :  { %v1531_v54 = vpop.f32.mrb[25].mxu1  ;;  %v996_v26 = vpack.c.bf16 %v942_v53, %v942_v53 }
 0x85a   :  { %v945_v55 = vpop.f32.mrb[26].mxu1 }
 0x85b   :  { %v1532_v56 = vpop.f32.mrb[27].mxu1 }
 0x85c   :  { %v990_v57 = vpop.f32.mrb[28].mxu0 }
 0x85d   :  { %v1537_v58 = vpop.f32.mrb[29].mxu0  ;;  %v997_v12 = vpack.c.bf16 %v990_v57, %v990_v57 }
 0x85e   :  { %v993_v59 = vpop.f32.mrb[30].mxu0 }
 0x85f   :  { %v1538_v60 = vpop.f32.mrb[31].mxu0 }
 0x862   :  { %v1042_v61 = vpop.f32.mrb[28].mxu1 }
 0x863   :  { %v1543_v62 = vpop.f32.mrb[29].mxu1  ;;  %v1098_v63 = vsel %vm342_vm2, %v1042_v61, -inf }
 0x864   :  { %1099 = vmax.xlane.f32.xlu0 %v1098_v63  ;;  %v1045_v1 = vpop.f32.mrb[30].mxu1  ;;  %v1092_v2 = vpop.f32.mrb[32].mxu0 }
 0x865   :  { %v1544_v4 = vpop.f32.mrb[31].mxu1  ;;  %v1549_v5 = vpop.f32.mrb[33].mxu0  ;;  %v1101_v6 = vsel %vm342_vm2, %v1092_v2, -inf }
 0x866   :  { %1102 = vmax.xlane.f32.xlu1 %v1101_v6  ;;  %v1095_v8 = vpop.f32.mrb[34].mxu0 }
 0x867   :  { %v1550_v9 = vpop.f32.mrb[35].mxu0 }
 0x877   :  { %1170 = vrot.lane.b32.xlu1 %v1973_v40, %s1782_s20 }
 0x87b   :  { %1222 = vrot.lane.b32.xlu1 %v774_v10, %s1783_s21 }
 0x87f   :  { %1224 = vrot.lane.b32.xlu1 %v775_v11, %s1783_s21 }
 0x883   :  { %1230 = vrot.lane.b32.xlu1 %v997_v12, %s1784_s22 }
 0x8f1   :  { %v1100_v13 = vpop.xlane.xlu0 %1099 }
 0x8f2   :  { %v1104_v15 = vsub.f32 %v1042_v61, %v1100_v13 }
 0x8f3   :  { %v1103_v16 = vpop.xlane.xlu1 %1102 }
 0x8f4   :  { %v1106_v17 = vmul.f32 1.442695, %v1104_v15  ;;  %v1105_v20 = vsub.f32 %v1092_v2, %v1103_v16 }
 0x8f6   :  { %1623 = vpow2.f32 %v1106_v17  ;;  %v1108_v40 = vmul.f32 1.442695, %v1105_v20 }
 0x8f7   :  { %v1171_v21 = vpop.permute.xlu1 %1170 }
 0x8f8   :  { %1625 = vpow2.f32 %v1108_v40  ;;  %v1176_v3 = vsel %vm462_vm3, %v1171_v21, 0 }
 0x8f9   :  { %1558 = vmatpush3.bf16.msra.mxu0 %v1176_v3 }
 0x8fb   :  { %v1223_v29 = vpop.permute.xlu1 %1222 }
 0x8fc   :  { %v1240_v54 = vsel %vm342_vm2, %v552_v51, %v1223_v29 }
 0x900   :  { %v1624_v22 = vpop.eup %1623 }
 0x901   :  { %v1110_v7 = vsel %vm342_vm2, %v1624_v22, 0.0 }
 0x902   :  { %v1626_v23 = vpop.eup %1625  ;;  %1111 = vadd.xlane.f32.xlu0 %v1110_v7 }
 0x903   :  { %v1113_v25 = vsel %vm342_vm2, %v1626_v23, 0.0 }
 0x906   :  { %1114 = vadd.xlane.f32.xlu0 %v1113_v25 }
 0x91c   :  { %1122 = vrot.lane.b32.xlu0 %v1971_v39, %s1782_s20 }
 0x920   :  { %1228 = vrot.lane.b32.xlu0 %v996_v26, %s1784_s22 }
 0x98f   :  { %v1112_v27 = vpop.xlane.xlu0 %1111 }
 0x990   :  { %1627 = vrcp.f32 %v1112_v27 }
 0x993   :  { %v1115_v28 = vpop.xlane.xlu0 %1114 }
 0x994   :  { %1629 = vrcp.f32 %v1115_v28 }
 0x997   :  { %v1123_v30 = vpop.permute.xlu0 %1122 }
 0x998   :  { %v1128_v32 = vsel %vm462_vm3, %v1123_v30, 0 }
 0x999   :  { %1552 = vmatpush3.bf16.msra.mxu1 %v1128_v32 }
 0x99a   :  { %v1628_v33 = vpop.eup %1627  ;;  %1563 = vmatprep.subr.bf16.mxu1 %v1778_v0 }
 0x99b   :  { %v1118_v34 = vmul.f32 %v1628_v33, %v1624_v22  ;;  %v1229_v49 = vpop.permute.xlu0 %1228 }
 0x99c   :  { %v1246_v57 = vsel %vm1244_vm4, %v1240_v54, %v1229_v49 }
 0x99d   :  { %v1120_v19 = vpack.c.bf16 %v1118_v34, %v1118_v34 }
 0x99e   :  { %v1630_v24 = vpop.eup %1629 }
 0x99f   :  { %v1119_v35 = vmul.f32 %v1630_v24, %v1626_v23  ;;  %1554 = vmatmul.mubr.msk.bf16.vlgmr.msra.gmra.mrb[32].mxu1 %vm342_vm2, %v1120_v19 }
 0x9a0   :  { %1567 = vmatprep.mubr.msk.bf16.mxu1 %vm1779_vm0, %v1778_v0  ;;  %1564 = vmatpush3.bf16.msra.mxu1 %v1597_v31 }
 0x9a1   :  { %v1121_v39 = vpack.c.bf16 %v1119_v35, %v1119_v35  ;;  %1565 = vmatprep.subr.bf16.mxu1 %v1778_v0  ;;  %v1225_v0 = vpop.permute.xlu1 %1224 }
 0x9a2   :  { %v1243_v55 = vsel %vm342_vm2, %v553_v52, %v1225_v0 }
 0x9a3   :  { %1560 = vmatmul.mubr.msk.bf16.vlgmr.msra.gmra.mrb[36].mxu0 %vm342_vm2, %v1121_v39 }
 0x9a4   :  { %1566 = vmatpush3.bf16.msra.mxu1 %v1598_v36 }
 0x9a5   :  { %v1231_v50 = vpop.permute.xlu1 %1230 }
 0x9a6   :  { %v1248_v56 = vsel %vm1244_vm4, %v1243_v55, %v1231_v50 }
 0xa72   :  { %v1164_v37 = vpop.f32.mrb[32].mxu1 }
 0xa73   :  { %v1218_v38 = vpack.c.bf16 %v1164_v37, %v1164_v37  ;;  %v1555_v41 = vpop.f32.mrb[33].mxu1 }
 0xa74   :  { %v1167_v42 = vpop.f32.mrb[34].mxu1 }
 0xa75   :  { %1234 = vrot.lane.b32.xlu0 %v1218_v38, %s1785_s25  ;;  %v1556_v43 = vpop.f32.mrb[35].mxu1 }
 0xa76   :  { %v1212_v44 = vpop.f32.mrb[36].mxu0 }
 0xa77   :  { %v1219_v45 = vpack.c.bf16 %v1212_v44, %v1212_v44  ;;  %v1561_v46 = vpop.f32.mrb[37].mxu0 }
 0xa78   :  { %v1215_v47 = vpop.f32.mrb[38].mxu0 }
 0xa79   :  { %1236 = vrot.lane.b32.xlu1 %v1219_v45, %s1785_s25  ;;  %v1562_v48 = vpop.f32.mrb[39].mxu0 }
 0xae7   :  { %v1235_v53 = vpop.permute.xlu0 %1234 }
 0xae8   :  { %v1251_v59 = vsel %vm1249_vm5, %v1246_v57, %v1235_v53 }
 0xaeb   :  { %v1237_v58 = vpop.permute.xlu1 %1236 }
 0xaec   :  { %v1253_v60 = vsel %vm1249_vm5, %v1248_v56, %v1237_v58 }
 0xaed   :  { %v1389_v61 = vcombine.low %v1251_v59, %v1253_v60 }
 0xaef   :  { %1568 = vmatmul.mubr.msk.bf16.vlgmr.msra.gmra.mrb[36].mxu1 %vm130_vm1, %v1389_v61 }
 0xbc2   :  { %v1320_v18 = vpop.f32.mrb[36].mxu1 }
 0xbc3   :  { %v1321_v62 = vadd.f32 %v1388_v14, %v1320_v18  ;;  %v1569_v63 = vpop.f32.mrb[37].mxu1 }
 0xbc4   :  { %v1323_v1 = vpop.f32.mrb[38].mxu1 }
 0xbc5   :  { %1327 = vst.msk [vmem:[#allocation11] sm:$0xff] %vm130_vm1, %v1321_v62  ;;  %v1324_v2 = vadd.f32 %v1388_v14, %v1323_v1  ;;  %v1570_v4 = vpop.f32.mrb[39].mxu1 }
 0xbc7   :  { %1328 = vst.msk [vmem:[#allocation11 + $0x8] sm:$0xff] %vm130_vm1, %v1324_v2 }
 0xbc8   :  { %1752 = shalt.err (!%p1749_p2)
}
 0xbc9   :  { %s1753_s10 = scalar_lea.hbm %s2147_s7, 256 }
 0xbca   :  { %p1754_p3 = scmp.ne.s32.totalorder %s2147_s7, %s1753_s10  ;;  %p1757_p4 = scmp.lt.u32.totalorder %s1753_s10, %s2147_s7 }
 0xbcc   :  { %p1759_p5 = pnand %p1757_p4, %p1754_p3 }
 0xbce   :  { %1762 = shalt.err (!%p1759_p5)
}
 0xbcf   :  { %s1787_s2 = smov 128  }
 0xbd0   :  { %1340 = dma.vmem_to_hbm [thread:$0]  %s1335_s29, 256, %s2147_s7, [#allocation4], %s1787_s2, %s1787_s2, %s1783_s21  }
 0xbd1   :  { %1769 = dma.done.wait [#allocation4], 256  }
 0xbd2   :  { %1770 = vsyncadd [#allocation4], 4294967040 }
 0xbd3   :  { %1344 = vsyncpa [#allocation3], 1 }
 0xbd4   :  { %1345 = vsyncpa [#allocation6], 1 }
 0xbd5   :  { %1346 = vsyncpa [#allocation9], 1 }
 0xbd6   :  { %1347 = vsyncpa [#allocation4], 1 }

</bundles_post_ra>
